<compile_context>
chip_gen: v7x
topology: tpu7x:2x2x1
jax: 0.10.0
libtpu: 0.0.40
codegen_flags: <defaults>
</compile_context>

<pallas_src>
import numpy as np
import jax
import jax.numpy as jnp
from jax import lax
from jax.experimental import pallas as pl
from jax.experimental.pallas import tpu as pltpu


# ----------------------------------------------------------------------------
# Fused kernel: synthetic-BERT dense+tanh (MXU) + span gather (dynamic slice).
# ----------------------------------------------------------------------------
def _make_fused_kernel(S, E, L, BB):
    """S: padded seq len (mult of 8), E: padded embed dim (mult of 128),
    L: padded max span len (mult of 8), BB: batch items per grid step."""

    def kernel(spans_ref, x_ref, w_ref, bias_ref, so_ref, scratch_ref):
        # --- encoder: one (BB*S, E) x (E, E) MXU matmul, f32 accumulate, ----
        # --- f32 bias + tanh epilogue (v5e has no bf16 VPU/EUP). ------------
        h = jnp.dot(x_ref[...], w_ref[...], preferred_element_type=jnp.float32)
        h = jnp.tanh(h + bias_ref[...])

        # Single store of the encoder result into a (BB*S + L, E) scratch.
        # Batch item b owns rows [b*S, (b+1)*S).  A dynamic slice of length L
        # starting at b*S + start (start in [0, S)) is always in bounds; any
        # slice rows past the item's own sequence sit at slice index
        # >= S - start >= span_length and are therefore always masked out by
        # the row < length select below, so the L tail rows need no init.
        scratch_ref[:BB * S, :] = h

        row = lax.broadcasted_iota(jnp.int32, (L, 1), 0)
        gb0 = pl.program_id(0) * BB
        for b in range(BB):                  # BB is small & static (<= 8)
            base = 4 * (gb0 + b)             # flat spans: [s0, s1, o0, o1]
            s_start = spans_ref[base + 0]
            s_len = spans_ref[base + 1] - s_start + 1
            o_start = spans_ref[base + 2]
            o_len = spans_ref[base + 3] - o_start + 1

            seg_s = scratch_ref[pl.ds(b * S + s_start, L), :]   # (L, E)
            seg_o = scratch_ref[pl.ds(b * S + o_start, L), :]   # (L, E)

            # merged output: rows [0, L) = subject span, [L, 2L) = object span
            so_ref[b, :L, :] = jnp.where(row < s_len, seg_s, 0.0)
            so_ref[b, L:, :] = jnp.where(row < o_len, seg_o, 0.0)

    return kernel


# ----------------------------------------------------------------------------
# VMEM budgeting / batch-tile selection.
# ----------------------------------------------------------------------------
def _vmem_usage(bb, S, E, L, in_bytes):
    x_in = 2 * bb * S * E * in_bytes          # double-buffered x block
    w_in = 2 * E * E * in_bytes               # weight block
    b_in = 2 * E * 4                          # bias block
    out = 2 * bb * 2 * L * E * 4              # double-buffered merged s/o out
    scratch = (bb * S + L) * E * 4            # encoder result scratch
    return x_in + w_in + b_in + out + scratch


def _choose_bb(B, S, E, L, in_bytes, budget=40 << 20, max_bb=8):
    # Prefer >= 4 grid steps so the pipeline double-buffers and the v7x
    # megacore gets >= 2 tiles per core; cap BB (static gather unroll).
    cap = min(max_bb, max(1, B // 4))
    bb = 1
    for cand in range(1, cap + 1):
        if _vmem_usage(cand, S, E, L, in_bytes) <= budget:
            bb = cand
    return bb


# ----------------------------------------------------------------------------
# Module-level forward: SimpleInputEncoding.forward
# ----------------------------------------------------------------------------
def simple_input_encoding_forward(params, sentence_tokens, so_pairs_np,
                                  *, matmul_dtype=jnp.bfloat16):
    """Returns ({'s_encoded','o_encoded','s_masks','o_masks'}, max_len).

    matmul_dtype (x, w) defaults to bf16 on all generations (half the input
    DMA, 2x MXU); accumulation, bias+tanh epilogue and outputs stay f32."""
    B, S = sentence_tokens.shape
    E = params["tok_emb"].shape[1]

    # max_len is data-dependent in the PyTorch code; resolved at trace time on
    # the host from the concrete numpy so_pairs.
    lens = so_pairs_np[:, :, 1] - so_pairs_np[:, :, 0] + 1          # (B, 2)
    max_len = int(lens.max())
    L = max(8, -(-max_len // 8) * 8)            # sublane aligned

    S_pad = -(-S // 8) * 8                      # sublane aligned
    E_pad = -(-E // 128) * 128                  # lane dense

    in_bytes = np.dtype(matmul_dtype).itemsize
    BB = _choose_bb(B, S_pad, E_pad, L, in_bytes)
    B_pad = -(-B // BB) * BB                    # remainder handled by padding
    grid = (B_pad // BB,)

    # Embedding lookups in plain JAX glue (gather); projection inside Pallas.
    x = params["tok_emb"][sentence_tokens] + params["pos_emb"][None, :S, :]
    # Zero-pad batch/seq/embed; padded rows/lanes never reach the real outputs.
    x = jnp.pad(x, ((0, B_pad - B), (0, S_pad - S), (0, E_pad - E)))
    x = x.astype(matmul_dtype).reshape(B_pad * S_pad, E_pad)   # wrapper reshape

    w = jnp.pad(params["w"],
                ((0, E_pad - E), (0, E_pad - E))).astype(matmul_dtype)
    bias = jnp.pad(params["b"], (0, E_pad - E)).reshape(1, E_pad)
    bias = bias.astype(jnp.float32)

    spans = np.zeros((B_pad, 2, 2), np.int32)   # pad spans -> [0,0],[0,0]
    spans[:B] = np.asarray(so_pairs_np, np.int32)
    spans_flat = jnp.asarray(spans.reshape(B_pad * 4))

    est = _vmem_usage(BB, S_pad, E_pad, L, in_bytes)
    vmem_limit = int(min(max(int(est * 1.5), 16 << 20), 48 << 20))

    so = pl.pallas_call(
        _make_fused_kernel(S_pad, E_pad, L, BB),
        out_shape=jax.ShapeDtypeStruct((B_pad, 2 * L, E_pad), jnp.float32),
        grid_spec=pltpu.PrefetchScalarGridSpec(
            num_scalar_prefetch=1,
            grid=grid,
            in_specs=[
                pl.BlockSpec((BB * S_pad, E_pad), lambda i, sp: (i, 0)),
                pl.BlockSpec((E_pad, E_pad), lambda i, sp: (0, 0)),
                pl.BlockSpec((1, E_pad), lambda i, sp: (0, 0)),
            ],
            out_specs=pl.BlockSpec((BB, 2 * L, E_pad),
                                   lambda i, sp: (i, 0, 0)),
            scratch_shapes=[pltpu.VMEM((BB * S_pad + L, E_pad), jnp.float32)],
        ),
        compiler_params=pltpu.CompilerParams(
            dimension_semantics=("parallel",),
            vmem_limit_bytes=vmem_limit),
    )(spans_flat, x, w, bias)

    s_enc = so[:B, :max_len, :E]
    o_enc = so[:B, L:L + max_len, :E]

    # Masks depend only on two scalars per item -> computed in the wrapper
    # (keeps lane-sparse (1, max_len) partial stores out of the kernel).
    pos = jnp.arange(max_len, dtype=jnp.int32)[None, :]
    s_masks = (pos < jnp.asarray(lens[:, 0], jnp.int32)[:, None]).astype(jnp.float32)
    o_masks = (pos < jnp.asarray(lens[:, 1], jnp.int32)[:, None]).astype(jnp.float32)

    out = {
        "s_encoded": s_enc,
        "o_encoded": o_enc,
        "s_masks": s_masks,
        "o_masks": o_masks,
    }
    return out, max_len


if __name__ == "__main__":
    # Small, deterministic config (B=8 so the batch tiling gives 4 grid steps).
    B, S, E, VOCAB = 8, 16, 32, 64

    key = jax.random.PRNGKey(0)
    k_tok, k_pos, k_w, k_b, k_ids = jax.random.split(key, 5)

    params = {
        "tok_emb": jax.random.normal(k_tok, (VOCAB, E), jnp.float32) * 0.02,
        "pos_emb": jax.random.normal(k_pos, (S, E), jnp.float32) * 0.02,
        "w": jax.random.normal(k_w, (E, E), jnp.float32) * 0.1,
        "b": jax.random.normal(k_b, (E,), jnp.float32) * 0.1,
    }

    sentence_tokens = jax.random.randint(k_ids, (B, S), 0, VOCAB, jnp.int32)

    # so_pairs[b] = [[s_start, s_end], [o_start, o_end]]  (inclusive ends)
    rng = np.random.RandomState(0)
    s_start = rng.randint(0, S - 4, size=B)
    s_end = s_start + rng.randint(0, 4, size=B)
    o_start = rng.randint(0, S - 6, size=B)
    o_end = o_start + rng.randint(0, 6, size=B)
    so_pairs = np.stack([np.stack([s_start, s_end], -1),
                         np.stack([o_start, o_end], -1)], axis=1).astype(np.int32)
    so_pairs[0, 0] = [S - 1, S - 1]     # 1-token span at the very last position
    so_pairs[1, 1] = [S - 6, S - 1]     # span ending at the last token

    out, max_len = simple_input_encoding_forward(params, sentence_tokens, so_pairs)
    jax.tree_util.tree_map(jax.block_until_ready, out)

    # Reference: same bf16-input / f32-accumulate numeric path as the kernel,
    # then a plain numpy replication of get_so_embedded.
    x_ref = params["tok_emb"][sentence_tokens] + params["pos_emb"][None, :S, :]
    h_ref = jnp.dot(x_ref.astype(jnp.bfloat16).reshape(B * S, E),
                    params["w"].astype(jnp.bfloat16),
                    preferred_element_type=jnp.float32)
    te = np.asarray(jnp.tanh(h_ref + params["b"][None, :]).reshape(B, S, E))

    ref_s = np.zeros((B, max_len, E), np.float32)
    ref_o = np.zeros((B, max_len, E), np.float32)
    ref_sm = np.zeros((B, max_len), np.float32)
    ref_om = np.zeros((B, max_len), np.float32)
    for i in range(B):
        s0, s1 = so_pairs[i, 0]
        o0, o1 = so_pairs[i, 1]
        ls, lo = s1 - s0 + 1, o1 - o0 + 1
        ref_s[i, :ls] = te[i, s0:s1 + 1]
        ref_o[i, :lo] = te[i, o0:o1 + 1]
        ref_sm[i, :ls] = 1.0
        ref_om[i, :lo] = 1.0

    np.testing.assert_allclose(np.asarray(out["s_encoded"]), ref_s, atol=1e-5)
    np.testing.assert_allclose(np.asarray(out["o_encoded"]), ref_o, atol=1e-5)
    np.testing.assert_allclose(np.asarray(out["s_masks"]), ref_sm, atol=1e-6)
    np.testing.assert_allclose(np.asarray(out["o_masks"]), ref_om, atol=1e-6)

    print("KERNEL_OK")
</pallas_src>

<mosaic_0001>
module attributes {stable_mosaic.version = 11 : i64} {
  func.func @kernel(%arg0: i32, %arg1: memref<32xi32, #tpu.memory_space<smem>>, %arg2: memref<32x128xbf16, #tpu.memory_space<vmem>>, %arg3: memref<128x128xbf16, #tpu.memory_space<vmem>>, %arg4: memref<1x128xf32, #tpu.memory_space<vmem>>, %arg5: memref<2x16x128xf32, #tpu.memory_space<vmem>>, %arg6: memref<40x128xf32, #tpu.memory_space<vmem>>) attributes {dimension_semantics = [#tpu.dimension_semantics<parallel>], iteration_bounds = array<i64: 4>, scalar_prefetch = 1 : i64, scratch_operands = 1 : i64, tpu.core_type = #tpu.core_type<tc>, window_params = [{transform_indices = @transform_0, window_bounds = array<i64: 32, 128>}, {pipeline_mode = #tpu.pipeline_mode<synchronous>, transform_indices = @transform_1, window_bounds = array<i64: 128, 128>}, {pipeline_mode = #tpu.pipeline_mode<synchronous>, transform_indices = @transform_2, window_bounds = array<i64: 1, 128>}, {transform_indices = @transform_3, window_bounds = array<i64: 2, 16, 128>}]} {
    %c0 = arith.constant 0 : index
    %c0_0 = arith.constant 0 : index
    %0 = vector.load %arg2[%c0, %c0_0] : memref<32x128xbf16, #tpu.memory_space<vmem>>, vector<32x128xbf16>
    %c0_1 = arith.constant 0 : index
    %c0_2 = arith.constant 0 : index
    %1 = vector.load %arg3[%c0_1, %c0_2] : memref<128x128xbf16, #tpu.memory_space<vmem>>, vector<128x128xbf16>
    %cst = arith.constant dense<0.000000e+00> : vector<32x128xf32>
    %2 = tpu.matmul %0, %1, %cst {dimension_numbers = #tpu.dot_dimension_numbers<[1], [0], [0], [1], [0, 0, 1, 1], [], []>} : vector<32x128xbf16>, vector<128x128xbf16>, vector<32x128xf32> -> vector<32x128xf32>
    %c0_3 = arith.constant 0 : index
    %c0_4 = arith.constant 0 : index
    %3 = vector.load %arg4[%c0_3, %c0_4] : memref<1x128xf32, #tpu.memory_space<vmem>>, vector<1x128xf32>
    %4 = vector.broadcast %3 : vector<1x128xf32> to vector<32x128xf32>
    %5 = arith.addf %2, %4 : vector<32x128xf32>
    %6 = math.tanh %5 : vector<32x128xf32>
    %c0_5 = arith.constant 0 : index
    %c0_6 = arith.constant 0 : index
    %7 = vector.load %arg6[%c0_5, %c0_6] : memref<40x128xf32, #tpu.memory_space<vmem>>, vector<32x128xf32>
    tpu.vector_store %arg6[%c0_5, %c0_6], %6 {strides = array<i32>} : memref<40x128xf32, #tpu.memory_space<vmem>>, vector<32x128xf32>,
    %8 = tpu.iota {dimensions = array<i32: 0>} : vector<8x1xi32>
    %c2_i32 = arith.constant 2 : i32
    %9 = arith.muli %arg0, %c2_i32 : i32
    %c0_i32 = arith.constant 0 : i32
    %10 = arith.addi %9, %c0_i32 : i32
    %c4_i32 = arith.constant 4 : i32
    %11 = arith.muli %c4_i32, %10 : i32
    %c0_i32_7 = arith.constant 0 : i32
    %12 = arith.addi %11, %c0_i32_7 : i32
    %13 = arith.index_cast %12 : i32 to index
    %14 = memref.load %arg1[%13] : memref<32xi32, #tpu.memory_space<smem>>
    %c1_i32 = arith.constant 1 : i32
    %15 = arith.addi %11, %c1_i32 : i32
    %16 = arith.index_cast %15 : i32 to index
    %17 = memref.load %arg1[%16] : memref<32xi32, #tpu.memory_space<smem>>
    %18 = arith.subi %17, %14 : i32
    %c1_i32_8 = arith.constant 1 : i32
    %19 = arith.addi %18, %c1_i32_8 : i32
    %c2_i32_9 = arith.constant 2 : i32
    %20 = arith.addi %11, %c2_i32_9 : i32
    %21 = arith.index_cast %20 : i32 to index
    %22 = memref.load %arg1[%21] : memref<32xi32, #tpu.memory_space<smem>>
    %c3_i32 = arith.constant 3 : i32
    %23 = arith.addi %11, %c3_i32 : i32
    %24 = arith.index_cast %23 : i32 to index
    %25 = memref.load %arg1[%24] : memref<32xi32, #tpu.memory_space<smem>>
    %26 = arith.subi %25, %22 : i32
    %c1_i32_10 = arith.constant 1 : i32
    %27 = arith.addi %26, %c1_i32_10 : i32
    %c0_i32_11 = arith.constant 0 : i32
    %28 = arith.addi %c0_i32_11, %14 : i32
    %29 = arith.index_cast %28 : i32 to index
    %c0_12 = arith.constant 0 : index
    %30 = vector.load %arg6[%29, %c0_12] : memref<40x128xf32, #tpu.memory_space<vmem>>, vector<8x128xf32>
    %c0_i32_13 = arith.constant 0 : i32
    %31 = arith.addi %c0_i32_13, %22 : i32
    %32 = arith.index_cast %31 : i32 to index
    %c0_14 = arith.constant 0 : index
    %33 = vector.load %arg6[%32, %c0_14] : memref<40x128xf32, #tpu.memory_space<vmem>>, vector<8x128xf32>
    %34 = vector.broadcast %19 : i32 to vector<8x1xi32>
    %35 = arith.cmpi slt, %8, %34 : vector<8x1xi32>
    %cst_15 = arith.constant 0.000000e+00 : f32
    %36 = vector.shape_cast %35 : vector<8x1xi1> to vector<8x1xi1>
    %37 = vector.broadcast %36 : vector<8x1xi1> to vector<8x128xi1>
    %38 = vector.broadcast %cst_15 : f32 to vector<8x128xf32>
    %39 = arith.select %37, %30, %38 : vector<8x128xi1>, vector<8x128xf32>
    %c0_16 = arith.constant 0 : index
    %c0_17 = arith.constant 0 : index
    %c0_18 = arith.constant 0 : index
    %40 = vector.load %arg5[%c0_16, %c0_17, %c0_18] : memref<2x16x128xf32, #tpu.memory_space<vmem>>, vector<1x8x128xf32>
    %41 = vector.shape_cast %40 : vector<1x8x128xf32> to vector<8x128xf32>
    %42 = vector.shape_cast %39 : vector<8x128xf32> to vector<1x8x128xf32>
    tpu.vector_store %arg5[%c0_16, %c0_17, %c0_18], %42 {strides = array<i32>} : memref<2x16x128xf32, #tpu.memory_space<vmem>>, vector<1x8x128xf32>,
    %43 = vector.broadcast %27 : i32 to vector<8x1xi32>
    %44 = arith.cmpi slt, %8, %43 : vector<8x1xi32>
    %cst_19 = arith.constant 0.000000e+00 : f32
    %45 = vector.shape_cast %44 : vector<8x1xi1> to vector<8x1xi1>
    %46 = vector.broadcast %45 : vector<8x1xi1> to vector<8x128xi1>
    %47 = vector.broadcast %cst_19 : f32 to vector<8x128xf32>
    %48 = arith.select %46, %33, %47 : vector<8x128xi1>, vector<8x128xf32>
    %c0_20 = arith.constant 0 : index
    %c8 = arith.constant 8 : index
    %c0_21 = arith.constant 0 : index
    %49 = vector.load %arg5[%c0_20, %c8, %c0_21] : memref<2x16x128xf32, #tpu.memory_space<vmem>>, vector<1x8x128xf32>
    %50 = vector.shape_cast %49 : vector<1x8x128xf32> to vector<8x128xf32>
    %51 = vector.shape_cast %48 : vector<8x128xf32> to vector<1x8x128xf32>
    tpu.vector_store %arg5[%c0_20, %c8, %c0_21], %51 {strides = array<i32>} : memref<2x16x128xf32, #tpu.memory_space<vmem>>, vector<1x8x128xf32>,
    %c1_i32_22 = arith.constant 1 : i32
    %52 = arith.addi %9, %c1_i32_22 : i32
    %c4_i32_23 = arith.constant 4 : i32
    %53 = arith.muli %c4_i32_23, %52 : i32
    %c0_i32_24 = arith.constant 0 : i32
    %54 = arith.addi %53, %c0_i32_24 : i32
    %55 = arith.index_cast %54 : i32 to index
    %56 = memref.load %arg1[%55] : memref<32xi32, #tpu.memory_space<smem>>
    %c1_i32_25 = arith.constant 1 : i32
    %57 = arith.addi %53, %c1_i32_25 : i32
    %58 = arith.index_cast %57 : i32 to index
    %59 = memref.load %arg1[%58] : memref<32xi32, #tpu.memory_space<smem>>
    %60 = arith.subi %59, %56 : i32
    %c1_i32_26 = arith.constant 1 : i32
    %61 = arith.addi %60, %c1_i32_26 : i32
    %c2_i32_27 = arith.constant 2 : i32
    %62 = arith.addi %53, %c2_i32_27 : i32
    %63 = arith.index_cast %62 : i32 to index
    %64 = memref.load %arg1[%63] : memref<32xi32, #tpu.memory_space<smem>>
    %c3_i32_28 = arith.constant 3 : i32
    %65 = arith.addi %53, %c3_i32_28 : i32
    %66 = arith.index_cast %65 : i32 to index
    %67 = memref.load %arg1[%66] : memref<32xi32, #tpu.memory_space<smem>>
    %68 = arith.subi %67, %64 : i32
    %c1_i32_29 = arith.constant 1 : i32
    %69 = arith.addi %68, %c1_i32_29 : i32
    %c16_i32 = arith.constant 16 : i32
    %70 = arith.addi %c16_i32, %56 : i32
    %71 = arith.index_cast %70 : i32 to index
    %c0_30 = arith.constant 0 : index
    %72 = vector.load %arg6[%71, %c0_30] : memref<40x128xf32, #tpu.memory_space<vmem>>, vector<8x128xf32>
    %c16_i32_31 = arith.constant 16 : i32
    %73 = arith.addi %c16_i32_31, %64 : i32
    %74 = arith.index_cast %73 : i32 to index
    %c0_32 = arith.constant 0 : index
    %75 = vector.load %arg6[%74, %c0_32] : memref<40x128xf32, #tpu.memory_space<vmem>>, vector<8x128xf32>
    %76 = vector.broadcast %61 : i32 to vector<8x1xi32>
    %77 = arith.cmpi slt, %8, %76 : vector<8x1xi32>
    %cst_33 = arith.constant 0.000000e+00 : f32
    %78 = vector.shape_cast %77 : vector<8x1xi1> to vector<8x1xi1>
    %79 = vector.broadcast %78 : vector<8x1xi1> to vector<8x128xi1>
    %80 = vector.broadcast %cst_33 : f32 to vector<8x128xf32>
    %81 = arith.select %79, %72, %80 : vector<8x128xi1>, vector<8x128xf32>
    %c1 = arith.constant 1 : index
    %c0_34 = arith.constant 0 : index
    %c0_35 = arith.constant 0 : index
    %82 = vector.load %arg5[%c1, %c0_34, %c0_35] : memref<2x16x128xf32, #tpu.memory_space<vmem>>, vector<1x8x128xf32>
    %83 = vector.shape_cast %82 : vector<1x8x128xf32> to vector<8x128xf32>
    %84 = vector.shape_cast %81 : vector<8x128xf32> to vector<1x8x128xf32>
    tpu.vector_store %arg5[%c1, %c0_34, %c0_35], %84 {strides = array<i32>} : memref<2x16x128xf32, #tpu.memory_space<vmem>>, vector<1x8x128xf32>,
    %85 = vector.broadcast %69 : i32 to vector<8x1xi32>
    %86 = arith.cmpi slt, %8, %85 : vector<8x1xi32>
    %cst_36 = arith.constant 0.000000e+00 : f32
    %87 = vector.shape_cast %86 : vector<8x1xi1> to vector<8x1xi1>
    %88 = vector.broadcast %87 : vector<8x1xi1> to vector<8x128xi1>
    %89 = vector.broadcast %cst_36 : f32 to vector<8x128xf32>
    %90 = arith.select %88, %75, %89 : vector<8x128xi1>, vector<8x128xf32>
    %c1_37 = arith.constant 1 : index
    %c8_38 = arith.constant 8 : index
    %c0_39 = arith.constant 0 : index
    %91 = vector.load %arg5[%c1_37, %c8_38, %c0_39] : memref<2x16x128xf32, #tpu.memory_space<vmem>>, vector<1x8x128xf32>
    %92 = vector.shape_cast %91 : vector<1x8x128xf32> to vector<8x128xf32>
    %93 = vector.shape_cast %90 : vector<8x128xf32> to vector<1x8x128xf32>
    tpu.vector_store %arg5[%c1_37, %c8_38, %c0_39], %93 {strides = array<i32>} : memref<2x16x128xf32, #tpu.memory_space<vmem>>, vector<1x8x128xf32>,
    return
  }
  func.func @transform_0(%arg0: i32, %arg1: memref<32xi32, #tpu.memory_space<smem>>) -> (i32, i32) {
    %c0_i32 = arith.constant 0 : i32
    %c0_i32_0 = arith.constant 0 : i32
    return %arg0, %c0_i32 : i32, i32
  }
  func.func @transform_1(%arg0: i32, %arg1: memref<32xi32, #tpu.memory_space<smem>>) -> (i32, i32) {
    %c0_i32 = arith.constant 0 : i32
    %c0_i32_0 = arith.constant 0 : i32
    %c0_i32_1 = arith.constant 0 : i32
    return %c0_i32, %c0_i32_0 : i32, i32
  }
  func.func @transform_2(%arg0: i32, %arg1: memref<32xi32, #tpu.memory_space<smem>>) -> (i32, i32) {
    %c0_i32 = arith.constant 0 : i32
    %c0_i32_0 = arith.constant 0 : i32
    %c0_i32_1 = arith.constant 0 : i32
    return %c0_i32, %c0_i32_0 : i32, i32
  }
  func.func @transform_3(%arg0: i32, %arg1: memref<32xi32, #tpu.memory_space<smem>>) -> (i32, i32, i32) {
    %c0_i32 = arith.constant 0 : i32
    %c0_i32_0 = arith.constant 0 : i32
    %c0_i32_1 = arith.constant 0 : i32
    return %arg0, %c0_i32, %c0_i32_0 : i32, i32, i32
  }
}

</mosaic_0001>

<bundles_post_ra>
// kernel: tpu_custom_call.1
= control target key start
LH: loop header
LB: loop body
LE: loop exit
PB: predicated region body
PF: predicated region fallthrough
CT: control target
= control target key end

     0   :  { %s1104_s0 = inlined_call_operand.hbm [shape: s32[32], index: 0, kind: input, shape index: {}]   ;;  %s1105_s1 = inlined_call_operand.hbm [shape: bf16[128,128], index: 1, kind: input, shape index: {}]   ;;  %s1106_s2 = inlined_call_operand.hbm [shape: bf16[128,128], index: 2, kind: input, shape index: {}]   ;;  %s1107_s3 = inlined_call_operand.vmem [shape: f32[1,128], index: 3, kind: input, shape index: {}]   ;;  %s1108_s4 = inlined_call_operand.hbm [shape: f32[8,16,128], index: 4, kind: output, shape index: {}]  }
   0x1   :  { %s674_s17 = scalar_lea.hbm %s1104_s0, 16 }
   0x2   :  { %p675_p0 = scmp.ne.s32.totalorder %s1104_s0, %s674_s17  ;;  %p678_p1 = scmp.lt.u32.totalorder %s674_s17, %s1104_s0 }
   0x4   :  { %p680_p2 = pnand %p678_p1, %p675_p0 }
   0x6   :  { %683 = shalt.err (!%p680_p2)  }
   0x7   :  { %s816_s22 = smov [#allocation4]  }
   0x8   :  { %10 = dma.hbm_to_smem %s1104_s0, 16, %s816_s22, [#allocation3] }
   0x9   :  { %786 = dma.done.wait [#allocation3], 16 }
   0xa   :  { %787 = vsyncadd [#allocation3], 4294967280 }
   0xb   :  { %12 = sfence }
   0xc   :  { %13 = vsyncpa [#allocation6], 0 }
   0xd   :  { %15 = vsyncpa [#allocation6 + $0x1], 0 }
   0xe   :  { %16 = vsyncpa [#allocation9], 0 }
   0xf   :  { %17 = vsyncpa [#allocation7], 0 }
  0x10   :  { %19 = vsyncpa [#allocation7 + $0x1], 0  ;;  %s861_s25 = smov 0   ;;  %s863_s26 = smov 0  }
  0x11   :  { %s865_s27 = smov 0   ;;  %s867_s28 = smov 0  }
  0x12 LB: > { %s882_s0 = sadd.s32 4294967295, %s814_s28   ;;  %s523_s29 = sadd.s32 4294967294, %s814_s28   ;;  %s814_s28 = sphi %s867_s28, %s1135_s28   ;;  %s810_s27 = sphi %s865_s27, %s1134_s27   ;;  %s806_s26 = sphi %s863_s26, %s1133_s26   ;;  %s802_s25 = sphi %s861_s25, %s1132_s25  }
  0x13   : > { %p45_p3 = scmp.ne.s32.totalorder %s806_s26, %s802_s25  ;;  %p1109_p4 = scmp.eq.s32.totalorder %s882_s0, 0 }
  0x14   : > { %p117_p6 = scmp.eq.s32.totalorder %s523_s29, 3  ;;  %p524_p8 = scmp.ge.s32.totalorder %s814_s28, 1 }
  0x15   : > { %p891_p7 = por %p1109_p4, %p45_p3  ;;  %p124_p10 = scmp.lt.s32.totalorder %s814_s28, 5 }
  0x16   : > { %p896_p9 = por %p117_p6, %p45_p3  ;;  %s817_s7 = smov [#allocation8]  }
  0x17   : > { %s1112_s30 = scalar_select %p891_p7, 1, 0 }
  0x18   : > { %s1113_s5 = scalar_select %p896_p9, 1, 0 }
  0x19   : > { %p901_p11 = pnand %p524_p8, %p124_p10  ;;  %s136_s8 = sshll.u32 %s817_s7, 4  ;;  %s137_s8 = int_to_ptr.vmem [resolvable:$true] %s136_s8 }
  0x1a   : > { %s914_s10 = sadd.s32 1, %s814_s28   ;;  %s32_s11 = sadd.s32 1, %s810_s27 }
  0x1b   : > { %s1114_s6 = scalar_select %p901_p11, 1, 0 }
  0x1c   : > { %p602_p12 = pneg %p901_p11  ;;  %s29_s12 = ssub.s32 %s814_s28, %s914_s10 }
  0x1d   : > { %s684_s15 = scalar_lea.hbm %s1106_s2, 1024 }
  0x1e   : > { %p909_p13 = pnand %p602_p12, %p1109_p4  ;;  %p685_p0 = scmp.ne.s32.totalorder %s1106_s2, %s684_s15 }
  0x1f   : > { %p691_p6 = scmp.lt.u32.totalorder %s684_s15, %s1106_s2 }
  0x20   : > { %p686_p1 = pneg %p909_p13 }
  0x22   : > { %p687_p2 = pnand %p686_p1, %p685_p0 }
  0x24   : > { %p688_p3 = pneg %p687_p2 }
  0x26   : > { %p693_p8 = pnand %p691_p6, %p688_p3 }
  0x28   : > { %696 = shalt.err (!%p693_p8)
}
  0x29   : > { %s697_s20 = scalar_lea.vmem %s137_s8, 1024  ;;  %p705_p5 = scmp.lt.s32.totalorder %s137_s8, %s137_s8 }
  0x2a   : > { %p698_p10 = scmp.ne.s32.totalorder %s137_s8, %s697_s20  ;;  %p706_p9 = scmp.lt.s32.totalorder %s697_s20, %s697_s20 }
  0x2c   : > { %p700_p12 = pnand %p698_p10, %p686_p1  ;;  %p707_p7 = por %p706_p9, %p705_p5 }
  0x2e   : > { %p701_p4 = pneg %p700_p12 }
  0x30   : > { %p708_p11 = pnand %p707_p7, %p701_p4 }
  0x32   : > { %711 = shalt.err (!%p708_p11)
}
  0x33   : > { %s818_s21 = smov 64   ;;  %s819_s22 = smov 4  }
  0x34   : > { %605 = dma.hbm_to_vmem [thread:$0]  (!%p909_p13), %s1106_s2, 1024, %s137_s8, [#allocation9], %s818_s21, %s818_s21, %s819_s22  }
  0x35   : > { %p30_p4 = scmp.eq.s32.totalorder %s29_s12, 0  ;;  %p39_p5 = scmp.ne.s32.totalorder %s810_s27, %s806_s26 }
  0x36   : > { %p40_p7 = scmp.eq.s32.totalorder %s814_s28, 0  ;;  %p615_p9 = scmp.lt.s32.totalorder %s814_s28, 4 }
  0x37   : > { %s943_s29 = scalar_select %p30_p4, %s810_s27, %s32_s11  }
  0x38   : > { %p41_p11 = por %p40_p7, %p39_p5  ;;  %p1116_p0 = scmp.eq.s32.totalorder %s882_s0, 3 }
  0x39   : > { %s153_s9 = sand.u32 1, %s810_s27   ;;  %s558_s13 = sshll.u32 %s814_s28, 8 }
  0x3a   : > { %p947_p1 = por %p1116_p0, %p39_p5  ;;  %s527_s14 = sshll.u32 %s153_s9, 4 }
  0x3b   : > { %s956_s17 = scalar_lea.hbm %s1105_s1, %s558_s13  ;;  %s157_s8 = scalar_lea.vmem [#allocation5], %s527_s14 }
  0x3c   : > { %s164_s11 = sshll.u32 %s157_s8, 4  ;;  %p958_p13 = pnand %p615_p9, %p41_p11  ;;  %s962_s11 = int_to_ptr.vmem [resolvable:$true] %s164_s11 }
  0x3d   : > { %s964_s18 = scalar_lea.sflag [#allocation6], %s153_s9  ;;  %s712_s19 = scalar_lea.hbm %s956_s17, 256 }
  0x3e   : > { %p713_p2 = scmp.ne.s32.totalorder %s956_s17, %s712_s19  ;;  %p714_p3 = pneg %p958_p13 }
  0x3f   : > { %s717_s24 = scalar_lea.hbm %s1105_s1, 1024  ;;  %p718_p10 = scmp.lt.u32.totalorder %s956_s17, %s1105_s1 }
  0x40   : > { %p715_p6 = pnand %p714_p3, %p713_p2  ;;  %p719_p12 = scmp.lt.u32.totalorder %s717_s24, %s712_s19 }
  0x41   : > { %p721_p5 = scmp.lt.u32.totalorder %s712_s19, %s956_s17 }
  0x42   : > { %p716_p8 = pneg %p715_p6  ;;  %p720_p4 = por %p719_p12, %p718_p10 }
  0x44   : > { %p722_p7 = por %p721_p5, %p720_p4 }
  0x46   : > { %p723_p9 = pnand %p722_p7, %p716_p8 }
  0x48   : > { %726 = shalt.err (!%p723_p9)
}
  0x49   : > { %s727_s9 = scalar_lea.vmem %s962_s11, 256  ;;  %s820_s15 = smov [#allocation5]  }
  0x4a   : > { %p728_p11 = scmp.ne.s32.totalorder %s962_s11, %s727_s9  ;;  %s732_s16 = sshll.u32 %s820_s15, 4  ;;  %s733_s16 = int_to_ptr.vmem [resolvable:$false] %s732_s16 }
  0x4b   : > { %s734_s8 = scalar_lea.vmem %s733_s16, 512  ;;  %p735_p6 = scmp.lt.s32.totalorder %s962_s11, %s733_s16 }
  0x4c   : > { %p730_p0 = pnand %p728_p11, %p714_p3  ;;  %p736_p10 = scmp.lt.s32.totalorder %s734_s8, %s727_s9 }
  0x4e   : > { %p731_p2 = pneg %p730_p0  ;;  %p737_p12 = por %p736_p10, %p735_p6 }
  0x50   : > { %p738_p4 = pnand %p737_p12, %p731_p2 }
  0x52   : > { %741 = shalt.err (!%p738_p4)
}
  0x53   : > { %609 = dma.hbm_to_vmem [thread:$0]  (!%p958_p13), %s956_s17, 256, %s962_s11, %s964_s18, %s818_s21, %s818_s21, %s819_s22  }
  0x54   : > { %p1119_p3 = scmp.ne.s32.totalorder %s1114_s6, 0 }
  0x55   : > { %s998_s19 = sand.u32 (!%p1119_p3), 1, %s806_s26   ;;  %p1120_p8 = scmp.ne.s32.totalorder (!%p1119_p3), %s1112_s30, 0 }
  0x56   : > { %176 = sbr.rel (%p1119_p3) target bundleno = 383 (0x17f), region = 32  ;;  %s531_s20 = sshll.u32 (!%p1119_p3), %s998_s19, 4 }
  0x57   : > { %s179_s23 = scalar_lea.sflag (!%p1119_p3), [#allocation6], %s998_s19  ;;  %s182_s24 = scalar_lea.vmem (!%p1119_p3), [#allocation5], %s531_s20 }
  0x5d   : > { %789 = dma.done.wait (%p1120_p8), %s179_s23, 256  }
  0x5e   : > { %791 = vsyncadd (%p1120_p8), %s179_s23, 4294967040  ;;  %p1121_p5 = scmp.eq.s32.totalorder %s882_s0, 0 }
  0x60   : > { %793 = dma.done.wait (%p1121_p5), [#allocation9], 1024   ;;  %p1122_p13 = pmov %p1121_p5 }
  0x61   : > { %v656_v0 = vld [vmem:[#allocation8] sm:$0xff]   ;;  %v657_v1 = vld [vmem:[#allocation8 + $0x8] sm:$0xff]   ;;  %v658_v2 = vld [vmem:[#allocation8 + $0x10] sm:$0xff]   ;;  %s546_s30 = sshll.u32 %s882_s0, 3  ;;  %v356_v21 = vlaneseq }
  0x62   : > { %795 = vsyncadd (%p1122_p13), [#allocation9], 4294966272  ;;  %574 = vmatprep.subr.bf16.mxu0 %v656_v0  ;;  %v659_v3 = vld [vmem:[#allocation8 + $0x18] sm:$0xff]   ;;  %v664_v4 = vld [vmem:[%s182_s24] sm:$0xff]   ;;  %s361_s22 = sadd.s32 1, %s546_s30  ;;  %s560_s17 = sadd.s32 4, %s546_s30 }
  0x63   : > { %575 = vmatpush3.bf16.msra.mxu0 %v656_v0  ;;  %590 = vmatprep.mubr.bf16.mxu0 %v664_v4  ;;  %v660_v5 = vld [vmem:[#allocation8 + $0x20] sm:$0xff]   ;;  %v661_v6 = vld [vmem:[#allocation8 + $0x28] sm:$0xff]   ;;  %v662_v7 = vld [vmem:[#allocation8 + $0x30] sm:$0xff]   ;;  %s365_s11 = sadd.s32 2, %s546_s30  ;;  %s1014_s12 = sld [smem:[#allocation4 + %s546_s30]]  ;;  %v357_v24 = vshrl.u32 %v356_v21, 7 }
  0x64   : > { %576 = vmatprep.subr.bf16.mxu0 %v657_v1  ;;  %v663_v8 = vld [vmem:[#allocation8 + $0x38] sm:$0xff]   ;;  %s367_s18 = sadd.s32 3, %s546_s30  ;;  %s362_s13 = sld [smem:[#allocation4 + %s361_s22]] }
  0x65   : > { %v665_v9 = vld [vmem:[%s182_s24 + $0x8] sm:$0xff]   ;;  %s390_s14 = sadd.s32 1, %s560_s17  ;;  %s394_s9 = sadd.s32 2, %s560_s17 }
  0x66   : > { %v534_v10 = vld [vmem:[%s1107_s3] ss:$0 sm:$0xff]  ;;  %s396_s15 = sadd.s32 3, %s560_s17  ;;  %s1016_s16 = sld [smem:[#allocation4 + %s365_s11]] }
  0x67   : > { %577 = vmatpush3.bf16.msra.mxu0 %v657_v1  ;;  %s368_s8 = sld [smem:[#allocation4 + %s367_s18]] }
  0x68   : > { %578 = vmatprep.subr.bf16.mxu0 %v658_v2  ;;  %s1018_s20 = sld [smem:[#allocation4 + %s560_s17]]  ;;  %s533_s17 = sshll.u32 %s998_s19, 5 }
  0x69   : > { %s391_s23 = sld [smem:[#allocation4 + %s390_s14]] }
  0x6a   : > { %s1020_s24 = sld [smem:[#allocation4 + %s394_s9]]  ;;  %s363_s6 = ssub.s32 %s362_s13, %s1014_s12 }
  0x6b   : > { %579 = vmatpush3.bf16.msra.mxu0 %v658_v2  ;;  %s397_s30 = sld [smem:[#allocation4 + %s396_s15]]  ;;  %s364_s18 = sadd.s32 1, %s363_s6 }
  0x6c   : > { %580 = vmatprep.subr.bf16.mxu0 %v659_v3  ;;  %v375_v25 = vstv %s364_s18  ;;  %s562_s15 = sshll.u32 %s882_s0, 9  ;;  %s371_s0 = scalar_lea.vmem [#allocation2], %s1014_s12 }
  0x6d   : > { %s369_s21 = ssub.s32 %s368_s8, %s1016_s16  ;;  %s208_s8 = scalar_lea.vmem [#allocation10], %s533_s17  ;;  %vm1028_vm0 = vcmp.lt.s32.totalorder %v357_v24, %v375_v25 }
  0x6e   : > { %s370_s14 = sadd.s32 1, %s369_s21  ;;  %s478_s6 = scalar_lea.vmem [#allocation2], %s1018_s20 }
  0x6f   : > { %581 = vmatpush3.bf16.msra.mxu0 %v659_v3  ;;  %s392_s22 = ssub.s32 %s391_s23, %s1018_s20  ;;  %v381_v26 = vstv %s370_s14  ;;  %s434_s23 = sshll.u32 %s208_s8, 4  ;;  %s1052_s23 = int_to_ptr.vmem [resolvable:$true] %s434_s23 }
  0x70   : > { %582 = vmatprep.subr.bf16.mxu0 %v660_v5  ;;  %s393_s9 = sadd.s32 1, %s392_s22  ;;  %vm1032_vm1 = vcmp.lt.s32.totalorder %v357_v24, %v381_v26  ;;  %s480_s12 = scalar_lea.vmem [#allocation2], %s1020_s24 }
  0x71   : > { %s398_s11 = ssub.s32 %s397_s30, %s1020_s24  ;;  %v406_v27 = vstv %s393_s9  ;;  %s373_s30 = scalar_lea.vmem [#allocation2], %s1016_s16 }
  0x72   : > { %s399_s13 = sadd.s32 1, %s398_s11  ;;  %vm1036_vm2 = vcmp.lt.s32.totalorder %v357_v24, %v406_v27  ;;  %s1050_s11 = scalar_lea.hbm %s1108_s4, %s562_s15 }
  0x73   : > { %583 = vmatpush3.bf16.msra.mxu0 %v660_v5  ;;  %v413_v28 = vstv %s399_s13  ;;  %s420_s16 = scalar_lea.sflag [#allocation7], %s998_s19  ;;  %s742_s20 = scalar_lea.vmem %s1052_s23, 512 }
  0x74   : > { %584 = vmatprep.subr.bf16.mxu0 %v661_v6  ;;  %vm1040_vm3 = vcmp.lt.s32.totalorder %v357_v24, %v413_v28  ;;  %p743_p7 = scmp.ne.s32.totalorder %s1052_s23, %s742_s20  ;;  %s821_s17 = smov [#allocation10]  }
  0x75   : > { %s746_s24 = sshll.u32 %s821_s17, 4  ;;  %s747_s24 = int_to_ptr.vmem [resolvable:$false] %s746_s24 }
  0x76   : > { %p744_p9 = pnand %p743_p7, %p947_p1  ;;  %s748_s18 = scalar_lea.vmem %s747_s24, 1024 }
  0x77   : > { %585 = vmatpush3.bf16.msra.mxu0 %v661_v6  ;;  %p749_p0 = scmp.lt.s32.totalorder %s1052_s23, %s747_s24  ;;  %p750_p2 = scmp.lt.s32.totalorder %s748_s18, %s742_s20 }
  0x78   : > { %586 = vmatprep.subr.bf16.mxu0 %v662_v7  ;;  %p745_p11 = pneg %p744_p9 }
  0x79   : > { %p751_p6 = por %p750_p2, %p749_p0 }
  0x7b   : > { %587 = vmatpush3.bf16.msra.mxu0 %v662_v7  ;;  %p752_p10 = pnand %p751_p6, %p745_p11 }
  0x7c   : > { %588 = vmatprep.subr.bf16.mxu0 %v663_v8 }
  0x7f   : > { %589 = vmatpush3.bf16.msra.mxu0 %v663_v8 }
  0x82   : > { %591 = vmatmul.mubr.bf16.vlgmr.msra.gmra.mrb[0].mxu0 %v665_v9 }
 0x155   : > { %v592_v11 = vpop.f32.mrb[0].mxu0 }
 0x156   : > { %v342_v12 = vadd.f32 %v592_v11, %v534_v10  ;;  %v333_v13 = vpop.f32.mrb[1].mxu0 }
 0x157   : > { %v334_v14 = vadd.f32 %v534_v10, %v333_v13  ;;  %v593_v15 = vpop.f32.mrb[2].mxu0 }
 0x158   : > { %666 = vtanh.f32 %v342_v12  ;;  %v345_v16 = vadd.f32 %v593_v15, %v534_v10  ;;  %v336_v17 = vpop.f32.mrb[3].mxu0 }
 0x159   : > { %668 = vtanh.f32 %v334_v14  ;;  %v337_v18 = vadd.f32 %v534_v10, %v336_v17 }
 0x15a   : > { %670 = vtanh.f32 %v345_v16 }
 0x15b   : > { %672 = vtanh.f32 %v337_v18 }
 0x162   : > { %v667_v19 = vpop.eup %666 }
 0x163   : > { %v669_v20 = vpop.eup %668  ;;  %354 = vst [vmem:[#allocation2 + $0x10] sm:$0xff] %v667_v19 }
 0x164   : > { %v671_v22 = vpop.eup %670  ;;  %352 = vst [vmem:[#allocation2] sm:$0xff] %v669_v20 }
 0x165   : > { %v673_v23 = vpop.eup %672  ;;  %355 = vst [vmem:[#allocation2 + $0x18] sm:$0xff] %v671_v22 }
 0x166   : > { %353 = vst [vmem:[#allocation2 + $0x8] sm:$0xff] %v673_v23 }
 0x16d   : > { %v372_v33 = vld [vmem:[%s371_s0] sm:$0xff]  ;;  %v548_v35 = vld [vmem:[%s478_s6 + $0x10] sm:$0xff] }
 0x16e   : > { %v374_v34 = vld [vmem:[%s373_s30] sm:$0xff]  ;;  %v379_v36 = vsel %vm1028_vm0, %v372_v33, 0.0  ;;  %v549_v38 = vld [vmem:[%s480_s12 + $0x10] sm:$0xff]  ;;  %v410_v39 = vsel %vm1036_vm2, %v548_v35, 0.0 }
 0x16f   : > { %v385_v37 = vsel %vm1032_vm1, %v374_v34, 0.0  ;;  %380 = vst [vmem:[%s208_s8] sm:$0xff] %v379_v36  ;;  %550 = vst [vmem:[%s208_s8 + $0x10] sm:$0xff] %v410_v39  ;;  %v417_v40 = vsel %vm1040_vm3, %v549_v38, 0.0 }
 0x170   : > { %386 = vst [vmem:[%s208_s8 + $0x8] sm:$0xff] %v385_v37  ;;  %551 = vst [vmem:[%s208_s8 + $0x18] sm:$0xff] %v417_v40 }
 0x171   : > { %755 = shalt.err (!%p752_p10)
}
 0x172   : > { %s756_s14 = scalar_lea.hbm %s1050_s11, 512  ;;  %s760_s15 = scalar_lea.hbm %s1108_s4, 2048 }
 0x173   : > { %p757_p12 = scmp.ne.s32.totalorder %s1050_s11, %s756_s14  ;;  %p761_p8 = scmp.lt.u32.totalorder %s1050_s11, %s1108_s4 }
 0x174   : > { %p762_p5 = scmp.lt.u32.totalorder %s760_s15, %s756_s14  ;;  %p764_p7 = scmp.lt.u32.totalorder %s756_s14, %s1050_s11 }
 0x175   : > { %p758_p4 = pnand %p757_p12, %p947_p1 }
 0x176   : > { %p763_p13 = por %p762_p5, %p761_p8 }
 0x177   : > { %p759_p3 = pneg %p758_p4 }
 0x178   : > { %p765_p9 = por %p764_p7, %p763_p13 }
 0x17a   : > { %p766_p11 = pnand %p765_p9, %p759_p3 }
 0x17c   : > { %769 = shalt.err (!%p766_p11)
}
 0x17d   : > { %s822_s30 = smov 128   ;;  %s823_s6 = smov 8  }
 0x17e   : > { %600 = dma.vmem_to_hbm [thread:$0]  (%p947_p1), %s1052_s23, 512, %s1050_s11, %s420_s16, %s822_s30, %s822_s30, %s823_s6  }
 0x17f PF: > { %p617_p0 = scmp.ge.s32.totalorder %s814_s28, 2  ;;  %s449_s21 = sand.u32 1, %s802_s25  }
 0x180   : > { %p1131_p2 = scmp.ne.s32.totalorder %s1113_s5, 0  ;;  %s450_s22 = scalar_lea.sflag [#allocation7], %s449_s21 }
 0x182   : > { %p611_p6 = pnand %p617_p0, %p1131_p2 }
 0x184   : > { %797 = dma.done.wait (!%p611_p6), %s450_s22, 512  }
 0x185   : > { %799 = vsyncadd (!%p611_p6), %s450_s22, 4294966784  ;;  %p22_p10 = scmp.ge.s32.totalorder %s914_s10, 6   ;;  %s1132_s25 = smov %s806_s26 }
 0x186   : > { %s1133_s26 = smov %s810_s27  ;;  %s1134_s27 = smov %s943_s29 }
 0x187   : > { %s1135_s28 = smov %s914_s10  ;;  %24 = sbr.rel (!%p22_p10) target bundleno = 18 (0x12), region = 86 }
 0x18e   :  { %455 = vsyncpa [#allocation6], 1 }
 0x18f   :  { %457 = vsyncpa [#allocation6 + $0x1], 1 }
 0x190   :  { %458 = vsyncpa [#allocation9], 1 }
 0x191   :  { %459 = vsyncpa [#allocation7], 1 }
 0x192   :  { %461 = vsyncpa [#allocation7 + $0x1], 1 }

</bundles_post_ra>
